<compile_context>
chip_gen: v7x
topology: tpu7x:2x2x1
jax: 0.10.0
libtpu: 0.0.40
codegen_flags: <defaults>
</compile_context>

<pallas_src>
import functools

import jax
import jax.numpy as jnp
from jax.experimental import pallas as pl
from jax.experimental.pallas import tpu as pltpu

FEAT = 512
OUT = 2
OUT_PAD = 128          # lane-dense padded logit width; real (B, 2) sliced out
BN_EPS = 1e-5
FUSED_MAX_B = 1024     # single-pass fused kernel up to this batch size
TILE_B = 1024          # batch tile for the two-pass path (~2 MiB per x block)
VMEM_LIMIT = 32 * 1024 * 1024   # safe on v5e/v6e/v7x; > v5e's 16 MiB default


def _linear_padded_store(h, w_ref, b_ref, o_ref):
    """y = h @ W.T + b, stored into a 128-lane padded block (pad cols = 0)."""
    y = jax.lax.dot_general(
        h, w_ref[...], (((1,), (1,)), ((), ())),       # contract feature dims
        preferred_element_type=jnp.float32,
    ) + b_ref[...]                                      # (rows, 2)
    o_ref[...] = jnp.zeros_like(o_ref)                  # full-width unmasked store
    o_ref[:, :OUT] = y                                  # tiny masked store (2 lanes)


def _fused_kernel(gamma_ref, beta_ref, w_ref, b_ref, x_ref, o_ref):
    """Single-pass BN(train) + ReLU + Linear for B <= FUSED_MAX_B (x read once)."""
    x = x_ref[...].astype(jnp.float32)                  # (B, 512)
    inv_b = 1.0 / x.shape[0]
    mean = jnp.sum(x, axis=0, keepdims=True) * inv_b    # (1, 512)
    d = x - mean
    var = jnp.sum(d * d, axis=0, keepdims=True) * inv_b  # biased variance
    scale = gamma_ref[...] * jax.lax.rsqrt(var + BN_EPS)  # EUP rsqrt (free slot)
    h = jnp.maximum(d * scale + beta_ref[...], 0.0)
    _linear_padded_store(h, w_ref, b_ref, o_ref)


def _stats_kernel(gamma_ref, beta_ref, x_ref, ss_ref, sum_ref, sumsq_ref, *, batch):
    """Pass 1: accumulate per-feature sum / sum-of-squares; finalize scale/shift."""
    i = pl.program_id(0)

    @pl.when(i == 0)
    def _init():
        sum_ref[...] = jnp.zeros_like(sum_ref)
        sumsq_ref[...] = jnp.zeros_like(sumsq_ref)

    x = x_ref[...].astype(jnp.float32)                  # (TB, 512)
    tb = x.shape[0]
    if batch % tb != 0:
        # Partial last tile: zero out-of-range rows (guards against garbage in
        # the padded region of the boundary block, including NaN bit patterns).
        # Extra cmp+select per element hides fully under the x HBM DMA.
        rows = jax.lax.broadcasted_iota(jnp.int32, x.shape, 0) + i * tb
        x = jnp.where(rows < batch, x, 0.0)

    # NOTE: an MXU ones-row matmul could offload this cross-sublane reduction,
    # but at >=512-row tiles this pass is HBM-DMA bound and the VALU/XLU reduce
    # hides under the x DMA, so keep the simpler, robust form.
    sum_ref[...] += jnp.sum(x, axis=0, keepdims=True)
    sumsq_ref[...] += jnp.sum(x * x, axis=0, keepdims=True)

    @pl.when(i == pl.num_programs(0) - 1)
    def _finalize():
        inv_b = 1.0 / batch
        mean = sum_ref[...] * inv_b
        var = jnp.maximum(sumsq_ref[...] * inv_b - mean * mean, 0.0)
        scale = gamma_ref[...] * jax.lax.rsqrt(var + BN_EPS)
        shift = beta_ref[...] - mean * scale
        ss_ref[0:1, :] = scale
        ss_ref[1:2, :] = shift


def _apply_kernel(ss_ref, w_ref, b_ref, x_ref, o_ref):
    """Pass 2: h = relu(x*scale + shift); o = h @ W.T + b (padded to 128 lanes)."""
    x = x_ref[...].astype(jnp.float32)                  # (TB, 512)
    scale = ss_ref[0:1, :]
    shift = ss_ref[1:2, :]
    h = jnp.maximum(x * scale + shift, 0.0)
    _linear_padded_store(h, w_ref, b_ref, o_ref)


@jax.jit
def mmface_liveness_forward(x, gamma, beta, w, b):
    """x: (B, 512) f32/bf16; gamma/beta: (512,); w: (2, 512) torch layout; b: (2,)."""
    B, F = x.shape
    assert F == FEAT

    # Tiny (KB-scale) parameter reshapes only — no padded-weight HBM traffic.
    gamma2 = gamma.reshape(1, FEAT).astype(jnp.float32)
    beta2 = beta.reshape(1, FEAT).astype(jnp.float32)
    w2 = w.astype(jnp.float32)                 # native (2, 512)
    b2 = b.reshape(1, OUT).astype(jnp.float32)

    if B <= FUSED_MAX_B:
        out_padded = pl.pallas_call(
            _fused_kernel,
            out_shape=jax.ShapeDtypeStruct((B, OUT_PAD), jnp.float32),
            grid=(1,),
            in_specs=[
                pl.BlockSpec((1, FEAT), lambda i: (0, 0)),      # gamma
                pl.BlockSpec((1, FEAT), lambda i: (0, 0)),      # beta
                pl.BlockSpec((OUT, FEAT), lambda i: (0, 0)),    # W (2, 512)
                pl.BlockSpec((1, OUT), lambda i: (0, 0)),       # bias (1, 2)
                pl.BlockSpec((B, FEAT), lambda i: (0, 0)),      # x
            ],
            out_specs=pl.BlockSpec((B, OUT_PAD), lambda i: (0, 0)),
            compiler_params=pltpu.CompilerParams(
                dimension_semantics=("arbitrary",),
                vmem_limit_bytes=VMEM_LIMIT),
        )(gamma2, beta2, w2, b2, x)
    else:
        nb = (B + TILE_B - 1) // TILE_B

        # Pass 1: batch statistics -> folded (2, 512) scale/shift.
        ss = pl.pallas_call(
            functools.partial(_stats_kernel, batch=B),
            out_shape=jax.ShapeDtypeStruct((2, FEAT), jnp.float32),
            grid=(nb,),
            in_specs=[
                pl.BlockSpec((1, FEAT), lambda i: (0, 0)),      # gamma
                pl.BlockSpec((1, FEAT), lambda i: (0, 0)),      # beta
                pl.BlockSpec((TILE_B, FEAT), lambda i: (i, 0)), # x tile
            ],
            out_specs=pl.BlockSpec((2, FEAT), lambda i: (0, 0)),
            scratch_shapes=[pltpu.VMEM((1, FEAT), jnp.float32),
                            pltpu.VMEM((1, FEAT), jnp.float32)],
            compiler_params=pltpu.CompilerParams(
                dimension_semantics=("arbitrary",),
                vmem_limit_bytes=VMEM_LIMIT),
        )(gamma2, beta2, x)

        # Pass 2: normalize + ReLU + Linear, pipelined over batch tiles.
        out_padded = pl.pallas_call(
            _apply_kernel,
            out_shape=jax.ShapeDtypeStruct((B, OUT_PAD), jnp.float32),
            grid=(nb,),
            in_specs=[
                pl.BlockSpec((2, FEAT), lambda i: (0, 0)),      # scale/shift
                pl.BlockSpec((OUT, FEAT), lambda i: (0, 0)),    # W (2, 512)
                pl.BlockSpec((1, OUT), lambda i: (0, 0)),       # bias (1, 2)
                pl.BlockSpec((TILE_B, FEAT), lambda i: (i, 0)), # x tile
            ],
            out_specs=pl.BlockSpec((TILE_B, OUT_PAD), lambda i: (i, 0)),
            compiler_params=pltpu.CompilerParams(
                dimension_semantics=("parallel",),              # megacore on v7x
                vmem_limit_bytes=VMEM_LIMIT),
        )(ss, w2, b2, x)

    return out_padded[:, :OUT]


def _reference_forward(x, gamma, beta, w, b):
    # Pure-JAX reference mirroring PyTorch training-mode forward.
    x = x.astype(jnp.float32)
    mean = jnp.mean(x, axis=0, keepdims=True)
    var = jnp.mean((x - mean) ** 2, axis=0, keepdims=True)   # biased variance
    h = (x - mean) / jnp.sqrt(var + BN_EPS) * gamma + beta
    h = jnp.maximum(h, 0.0)
    return h @ w.T + b


if __name__ == "__main__":
    key = jax.random.PRNGKey(0)
    kx, kg, kb, kw, kbias = jax.random.split(key, 5)

    # Deterministic synthetic parameters (shapes match the PyTorch module).
    gamma = 1.0 + 0.1 * jax.random.normal(kg, (FEAT,), jnp.float32)   # BN weight
    beta = 0.1 * jax.random.normal(kb, (FEAT,), jnp.float32)          # BN bias
    w = 0.05 * jax.random.normal(kw, (OUT, FEAT), jnp.float32)        # Linear weight
    b = 0.05 * jax.random.normal(kbias, (OUT,), jnp.float32)          # Linear bias

    # 1) Small batch -> fused single-pass kernel path.
    x_small = jax.random.normal(kx, (8, FEAT), jnp.float32)
    out_small = jax.block_until_ready(
        mmface_liveness_forward(x_small, gamma, beta, w, b))
    ref_small = _reference_forward(x_small, gamma, beta, w, b)
    assert out_small.shape == (8, OUT)
    assert jnp.allclose(out_small, ref_small, atol=1e-4, rtol=1e-4)

    # 2) Larger batch, not a tile multiple -> two-pass tiled path (+ masking).
    x_big = jax.random.normal(kx, (1360, FEAT), jnp.float32)
    out_big = jax.block_until_ready(
        mmface_liveness_forward(x_big, gamma, beta, w, b))
    ref_big = _reference_forward(x_big, gamma, beta, w, b)
    assert out_big.shape == (1360, OUT)
    assert jnp.allclose(out_big, ref_big, atol=5e-4, rtol=5e-4)

    # 3) bf16 activations -> upcast happens inside the kernel (no HBM f32 copy).
    x_bf16 = x_big.astype(jnp.bfloat16)
    out_bf16 = jax.block_until_ready(
        mmface_liveness_forward(x_bf16, gamma, beta, w, b))
    ref_bf16 = _reference_forward(x_bf16, gamma, beta, w, b)
    assert out_bf16.shape == (1360, OUT)
    assert jnp.allclose(out_bf16, ref_bf16, atol=2e-3, rtol=2e-3)

    print("KERNEL_OK")
</pallas_src>

<mosaic_0001>
module attributes {stable_mosaic.version = 11 : i64} {
  func.func @_fused_kernel(%arg0: i32, %arg1: memref<1x512xf32, #tpu.memory_space<vmem>>, %arg2: memref<1x512xf32, #tpu.memory_space<vmem>>, %arg3: memref<2x512xf32, #tpu.memory_space<vmem>>, %arg4: memref<1x2xf32, #tpu.memory_space<vmem>>, %arg5: memref<8x512xf32, #tpu.memory_space<vmem>>, %arg6: memref<8x128xf32, #tpu.memory_space<vmem>>) attributes {dimension_semantics = [#tpu.dimension_semantics<arbitrary>], iteration_bounds = array<i64: 1>, scalar_prefetch = 0 : i64, scratch_operands = 0 : i64, tpu.core_type = #tpu.core_type<tc>, window_params = [{pipeline_mode = #tpu.pipeline_mode<synchronous>, transform_indices = @transform_0, window_bounds = array<i64: 1, 512>}, {pipeline_mode = #tpu.pipeline_mode<synchronous>, transform_indices = @transform_1, window_bounds = array<i64: 1, 512>}, {pipeline_mode = #tpu.pipeline_mode<synchronous>, transform_indices = @transform_2, window_bounds = array<i64: 2, 512>}, {pipeline_mode = #tpu.pipeline_mode<synchronous>, transform_indices = @transform_3, window_bounds = array<i64: 1, 2>}, {pipeline_mode = #tpu.pipeline_mode<synchronous>, transform_indices = @transform_4, window_bounds = array<i64: 8, 512>}, {pipeline_mode = #tpu.pipeline_mode<synchronous>, transform_indices = @transform_5, window_bounds = array<i64: 8, 128>}]} {
    %c0 = arith.constant 0 : index
    %c0_0 = arith.constant 0 : index
    %0 = vector.load %arg5[%c0, %c0_0] : memref<8x512xf32, #tpu.memory_space<vmem>>, vector<8x512xf32>
    %cst = arith.constant dense<0.000000e+00> : vector<512xf32>
    %1 = vector.multi_reduction <add>, %0, %cst [0] : vector<8x512xf32> to vector<512xf32>
    %2 = vector.shape_cast %1 : vector<512xf32> to vector<1x512xf32>
    %cst_1 = arith.constant 1.250000e-01 : f32
    %3 = vector.broadcast %cst_1 : f32 to vector<1x512xf32>
    %4 = arith.mulf %2, %3 : vector<1x512xf32>
    %5 = vector.broadcast %4 : vector<1x512xf32> to vector<8x512xf32>
    %6 = arith.subf %0, %5 : vector<8x512xf32>
    %7 = arith.mulf %6, %6 : vector<8x512xf32>
    %cst_2 = arith.constant dense<0.000000e+00> : vector<512xf32>
    %8 = vector.multi_reduction <add>, %7, %cst_2 [0] : vector<8x512xf32> to vector<512xf32>
    %9 = vector.shape_cast %8 : vector<512xf32> to vector<1x512xf32>
    %cst_3 = arith.constant 1.250000e-01 : f32
    %10 = vector.broadcast %cst_3 : f32 to vector<1x512xf32>
    %11 = arith.mulf %9, %10 : vector<1x512xf32>
    %c0_4 = arith.constant 0 : index
    %c0_5 = arith.constant 0 : index
    %12 = vector.load %arg1[%c0_4, %c0_5] : memref<1x512xf32, #tpu.memory_space<vmem>>, vector<1x512xf32>
    %cst_6 = arith.constant 9.99999974E-6 : f32
    %13 = vector.broadcast %cst_6 : f32 to vector<1x512xf32>
    %14 = arith.addf %11, %13 : vector<1x512xf32>
    %15 = math.rsqrt %14 : vector<1x512xf32>
    %16 = arith.mulf %12, %15 : vector<1x512xf32>
    %17 = vector.broadcast %16 : vector<1x512xf32> to vector<8x512xf32>
    %18 = arith.mulf %6, %17 : vector<8x512xf32>
    %c0_7 = arith.constant 0 : index
    %c0_8 = arith.constant 0 : index
    %19 = vector.load %arg2[%c0_7, %c0_8] : memref<1x512xf32, #tpu.memory_space<vmem>>, vector<1x512xf32>
    %20 = vector.broadcast %19 : vector<1x512xf32> to vector<8x512xf32>
    %21 = arith.addf %18, %20 : vector<8x512xf32>
    %cst_9 = arith.constant 0.000000e+00 : f32
    %22 = vector.broadcast %cst_9 : f32 to vector<8x512xf32>
    %23 = arith.maximumf %21, %22 : vector<8x512xf32>
    %c0_10 = arith.constant 0 : index
    %c0_11 = arith.constant 0 : index
    %24 = vector.load %arg3[%c0_10, %c0_11] : memref<2x512xf32, #tpu.memory_space<vmem>>, vector<2x512xf32>
    %cst_12 = arith.constant dense<0.000000e+00> : vector<8x2xf32>
    %25 = tpu.matmul %23, %24, %cst_12 {dimension_numbers = #tpu.dot_dimension_numbers<[1], [1], [0], [0], [0, 0, 1, 0], [], []>} : vector<8x512xf32>, vector<2x512xf32>, vector<8x2xf32> -> vector<8x2xf32>
    %c0_13 = arith.constant 0 : index
    %c0_14 = arith.constant 0 : index
    %26 = vector.load %arg4[%c0_13, %c0_14] : memref<1x2xf32, #tpu.memory_space<vmem>>, vector<1x2xf32>
    %27 = vector.broadcast %26 : vector<1x2xf32> to vector<8x2xf32>
    %28 = arith.addf %25, %27 : vector<8x2xf32>
    %cst_15 = arith.constant 0.000000e+00 : f32
    %29 = vector.broadcast %cst_15 : f32 to vector<8x128xf32>
    %c0_16 = arith.constant 0 : index
    %c0_17 = arith.constant 0 : index
    %30 = vector.load %arg6[%c0_16, %c0_17] : memref<8x128xf32, #tpu.memory_space<vmem>>, vector<8x128xf32>
    tpu.vector_store %arg6[%c0_16, %c0_17], %29 {strides = array<i32>} : memref<8x128xf32, #tpu.memory_space<vmem>>, vector<8x128xf32>,
    %c0_18 = arith.constant 0 : index
    %c0_19 = arith.constant 0 : index
    %31 = vector.load %arg6[%c0_18, %c0_19] : memref<8x128xf32, #tpu.memory_space<vmem>>, vector<8x2xf32>
    tpu.vector_store %arg6[%c0_18, %c0_19], %28 {strides = array<i32>} : memref<8x128xf32, #tpu.memory_space<vmem>>, vector<8x2xf32>,
    return
  }
  func.func @transform_0(%arg0: i32) -> (i32, i32) {
    %c0_i32 = arith.constant 0 : i32
    %c0_i32_0 = arith.constant 0 : i32
    %c0_i32_1 = arith.constant 0 : i32
    return %c0_i32, %c0_i32_0 : i32, i32
  }
  func.func @transform_1(%arg0: i32) -> (i32, i32) {
    %c0_i32 = arith.constant 0 : i32
    %c0_i32_0 = arith.constant 0 : i32
    %c0_i32_1 = arith.constant 0 : i32
    return %c0_i32, %c0_i32_0 : i32, i32
  }
  func.func @transform_2(%arg0: i32) -> (i32, i32) {
    %c0_i32 = arith.constant 0 : i32
    %c0_i32_0 = arith.constant 0 : i32
    %c0_i32_1 = arith.constant 0 : i32
    return %c0_i32, %c0_i32_0 : i32, i32
  }
  func.func @transform_3(%arg0: i32) -> (i32, i32) {
    %c0_i32 = arith.constant 0 : i32
    %c0_i32_0 = arith.constant 0 : i32
    %c0_i32_1 = arith.constant 0 : i32
    return %c0_i32, %c0_i32_0 : i32, i32
  }
  func.func @transform_4(%arg0: i32) -> (i32, i32) {
    %c0_i32 = arith.constant 0 : i32
    %c0_i32_0 = arith.constant 0 : i32
    %c0_i32_1 = arith.constant 0 : i32
    return %c0_i32, %c0_i32_0 : i32, i32
  }
  func.func @transform_5(%arg0: i32) -> (i32, i32) {
    %c0_i32 = arith.constant 0 : i32
    %c0_i32_0 = arith.constant 0 : i32
    %c0_i32_1 = arith.constant 0 : i32
    return %c0_i32, %c0_i32_0 : i32, i32
  }
}

</mosaic_0001>

<bundles_post_ra>
// kernel: mmface_liveness_forward.1
= control target key start
LH: loop header
LB: loop body
LE: loop exit
PB: predicated region body
PF: predicated region fallthrough
CT: control target
= control target key end

     0   :  { %10 = vsyncpa [#allocation3], 0  ;;  %s412_s18 = smov [#allocation2]   ;;  %s504_s0 = inlined_call_operand.vmem [shape: f32[1,512], index: 0, kind: input, shape index: {}]   ;;  %s505_s1 = inlined_call_operand.vmem [shape: f32[1,512], index: 1, kind: input, shape index: {}]   ;;  %s506_s2 = inlined_call_operand.vmem [shape: f32[2,512], index: 2, kind: input, shape index: {}]   ;;  %s507_s3 = inlined_call_operand.vmem [shape: f32[1,2], index: 3, kind: input, shape index: {}]   ;;  %s508_s4 = inlined_call_operand.hbm [shape: f32[8,512], index: 4, kind: input, shape index: {}]   ;;  %s509_s5 = inlined_call_operand.vmem [shape: f32[8,128], index: 5, kind: output, shape index: {}]  }
   0x1   :  { %s25_s19 = sshll.u32 %s412_s18, 4  ;;  %s388_s22 = scalar_lea.hbm %s508_s4, 512  ;;  %s26_s19 = int_to_ptr.vmem [resolvable:$true] %s25_s19 }
   0x2   :  { %p389_p0 = scmp.ne.s32.totalorder %s508_s4, %s388_s22  ;;  %p392_p1 = scmp.lt.u32.totalorder %s388_s22, %s508_s4 }
   0x4   :  { %p394_p2 = pnand %p392_p1, %p389_p0 }
   0x6   :  { %397 = shalt.err (!%p394_p2)
}
   0x7   :  { %s398_s27 = scalar_lea.vmem %s26_s19, 512  ;;  %p403_p4 = scmp.lt.s32.totalorder %s26_s19, %s26_s19 }
   0x8   :  { %p399_p3 = scmp.ne.s32.totalorder %s26_s19, %s398_s27  ;;  %p404_p5 = scmp.lt.s32.totalorder %s398_s27, %s398_s27 }
   0xa   :  { %p405_p6 = por %p404_p5, %p403_p4 }
   0xc   :  { %p406_p7 = pnand %p405_p6, %p399_p3 }
   0xe   :  { %409 = shalt.err (!%p406_p7)
}
   0xf   :  { %28 = dma.hbm_to_vmem [thread:$0]  %s508_s4, 512, %s26_s19, [#allocation3]  }
  0x10   :  { %410 = dma.done.wait [#allocation3], 512  }
  0x11   :  { %411 = vsyncadd [#allocation3], 4294966784  ;;  %v118_v0 = vlaneseq  ;;  %v413_v1 = vmov 1983009808   ;;  %v194_v6 = vld [vmem:[%s506_s2] sm:$0xff]  ;;  %v33_v8 = vld [vmem:[#allocation2 + $0x8] sm:$0xff] }
  0x12   :  { %v205_v2 = vunpack.c.l.s4 %v413_v1  ;;  %v32_v7 = vld [vmem:[#allocation2] sm:$0xff]  ;;  %v203_v10 = vcombine.high %v194_v6, %v194_v6  ;;  %v34_v11 = vld [vmem:[#allocation2 + $0x10] sm:$0xff]  ;;  %v35_v12 = vld [vmem:[#allocation2 + $0x18] sm:$0xff]  ;;  %v42_v14 = vrot.slane %v33_v8, 4  ;;  %vm365_vm0 = vcmask 15360  }
  0x13   :  { %v458_v3 = vshrl.u32 %v118_v0, 7  ;;  %v36_v13 = vrot.slane %v32_v7, 4  ;;  %v48_v15 = vrot.slane %v34_v11, 4  ;;  %v54_v16 = vrot.slane %v35_v12, 4 }
  0x14   :  { %v206_v4 = vunpack.c.0.s8 %v205_v2  ;;  %v43_v20 = vadd.f32 %v42_v14, %v33_v8 }
  0x15   :  { %v37_v19 = vadd.f32 %v36_v13, %v32_v7  ;;  %v49_v21 = vadd.f32 %v48_v15, %v34_v11  ;;  %v55_v22 = vadd.f32 %v54_v16, %v35_v12 }
  0x16   :  { %v209_v5 = vsub.s32 %v206_v4, %v458_v3  ;;  %v44_v25 = vrot.slane %v43_v20, 2 }
  0x17   :  { %v38_v24 = vrot.slane %v37_v19, 2  ;;  %v50_v26 = vrot.slane %v49_v21, 2  ;;  %v56_v27 = vrot.slane %v55_v22, 2 }
  0x18   :  { %v210_v9 = vrot.slane %v194_v6, %v209_v5  ;;  %v217_v18 = vrot.slane %v203_v10, %v209_v5  ;;  %v45_v29 = vadd.f32 %v44_v25, %v43_v20 }
  0x19   :  { %v39_v28 = vadd.f32 %v38_v24, %v37_v19  ;;  %v51_v30 = vadd.f32 %v50_v26, %v49_v21  ;;  %v57_v31 = vadd.f32 %v56_v27, %v55_v22  ;;  %v414_v21 = vmov 1966171168  }
  0x1a   :  { %v218_v17 = vcombine.high %v210_v9, %v210_v9  ;;  %v219_v23 = vcombine.high %v217_v18, %v217_v18  ;;  %v46_v33 = vrot.slane %v45_v29, 1  ;;  %v116_v22 = vunpack.c.l.s4 %v414_v21 }
  0x1b   :  { %v40_v32 = vrot.slane %v39_v28, 1  ;;  %v52_v34 = vrot.slane %v51_v30, 1  ;;  %v58_v35 = vrot.slane %v57_v31, 1 }
  0x1c   :  { %224 = vmatprep.subr.mxu1 %v218_v17  ;;  %294 = vmatprep.subr.mxu0 %v219_v23  ;;  %v47_v37 = vadd.f32 %v46_v33, %v45_v29  ;;  %v117_v23 = vunpack.c.0.s8 %v116_v22 }
  0x1d   :  { %225 = vmatpush1.xpose.msra.mxu1 %v210_v9  ;;  %295 = vmatpush1.xpose.msra.mxu0 %v217_v18  ;;  %v41_v36 = vadd.f32 %v40_v32, %v39_v28  ;;  %v53_v38 = vadd.f32 %v52_v34, %v51_v30  ;;  %v59_v39 = vadd.f32 %v58_v35, %v57_v31  ;;  %v100_v34 = vld [vmem:[%s504_s0] sm:$0xf]  ;;  %v146_v35 = vsub.s32 1, %v458_v3 }
  0x1e   :  { %v61_v41 = vmul.f32 0.125, %v47_v37  ;;  %v120_v25 = vsub.s32 %v117_v23, %v458_v3  ;;  %v164_v37 = vld [vmem:[%s505_s1] sm:$0xf] }
  0x1f   :  { %v60_v40 = vmul.f32 0.125, %v41_v36  ;;  %v62_v42 = vmul.f32 0.125, %v53_v38  ;;  %v63_v43 = vmul.f32 0.125, %v59_v39  ;;  %v142_v38 = vsub.s32 0, %v458_v3 }
  0x20   :  { %v466_v45 = vsub.f32 %v33_v8, %v61_v41  ;;  %v154_v39 = vsub.s32 3, %v458_v3 }
  0x21   :  { %v464_v44 = vsub.f32 %v32_v7, %v60_v40  ;;  %v468_v46 = vsub.f32 %v34_v11, %v62_v42  ;;  %v470_v47 = vsub.f32 %v35_v12, %v63_v43  ;;  %v150_v40 = vsub.s32 2, %v458_v3 }
  0x22   :  { %v69_v49 = vmul.f32 %v466_v45, %v466_v45  ;;  %v173_v42 = vrot.slane %v164_v37, %v146_v35  ;;  %v169_v43 = vrot.slane %v164_v37, %v142_v38 }
  0x23   :  { %v68_v48 = vmul.f32 %v464_v44, %v464_v44  ;;  %v70_v50 = vmul.f32 %v468_v46, %v468_v46  ;;  %v71_v51 = vmul.f32 %v470_v47, %v470_v47 }
  0x24   :  { %v78_v53 = vrot.slane %v69_v49, 4 }
  0x25   :  { %v72_v52 = vrot.slane %v68_v48, 4  ;;  %v84_v54 = vrot.slane %v70_v50, 4  ;;  %v90_v55 = vrot.slane %v71_v51, 4 }
  0x26   :  { %v79_v57 = vadd.f32 %v78_v53, %v69_v49  ;;  %v177_v49 = vrot.slane %v164_v37, %v150_v40 }
  0x27   :  { %v73_v56 = vadd.f32 %v72_v52, %v68_v48  ;;  %v85_v58 = vadd.f32 %v84_v54, %v70_v50  ;;  %v91_v59 = vadd.f32 %v90_v55, %v71_v51  ;;  %v181_v48 = vrot.slane %v164_v37, %v154_v39 }
  0x28   :  { %v80_v61 = vrot.slane %v79_v57, 2 }
  0x29   :  { %v74_v60 = vrot.slane %v73_v56, 2  ;;  %v86_v62 = vrot.slane %v85_v58, 2  ;;  %v92_v63 = vrot.slane %v91_v59, 2 }
  0x2a   :  { %v81_v1 = vadd.f32 %v80_v61, %v79_v57 }
  0x2b   :  { %v75_v0 = vadd.f32 %v74_v60, %v73_v56  ;;  %v87_v2 = vadd.f32 %v86_v62, %v85_v58  ;;  %v93_v4 = vadd.f32 %v92_v63, %v91_v59 }
  0x2c   :  { %v82_v6 = vrot.slane %v81_v1, 1 }
  0x2d   :  { %v76_v5 = vrot.slane %v75_v0, 1  ;;  %v88_v7 = vrot.slane %v87_v2, 1  ;;  %v94_v8 = vrot.slane %v93_v4, 1 }
  0x2e   :  { %v83_v10 = vadd.f32 %v82_v6, %v81_v1  ;;  %v415_v1 = vmov 0.0  }
  0x2f   :  { %v77_v9 = vadd.f32 %v76_v5, %v75_v0  ;;  %v89_v11 = vadd.f32 %v88_v7, %v87_v2  ;;  %v95_v12 = vadd.f32 %v94_v8, %v93_v4  ;;  %364 = vst [vmem:[%s509_s5] sm:$0xff] %v415_v1 }
  0x30   :  { %v97_v14 = vmul.f32 0.125, %v83_v10 }
  0x31   :  { %v96_v13 = vmul.f32 0.125, %v77_v9  ;;  %v98_v15 = vmul.f32 0.125, %v89_v11  ;;  %v99_v16 = vmul.f32 0.125, %v95_v12 }
  0x32   :  { %v102_v18 = vadd.f32 1e-05, %v97_v14 }
  0x33   :  { %v101_v17 = vadd.f32 1e-05, %v96_v13  ;;  %v103_v19 = vadd.f32 1e-05, %v98_v15  ;;  %v104_v20 = vadd.f32 1e-05, %v99_v16 }
  0x35   :  { %380 = vrsqrt.f32 %v101_v17 }
  0x36   :  { %382 = vrsqrt.f32 %v102_v18 }
  0x37   :  { %384 = vrsqrt.f32 %v103_v19 }
  0x38   :  { %386 = vrsqrt.f32 %v104_v20 }
  0x3f   :  { %v381_v24 = vpop.eup %380 }
  0x40   :  { %v383_v26 = vpop.eup %382 }
  0x41   :  { %v385_v27 = vpop.eup %384  ;;  %v113_v28 = vcombine.low %v381_v24, %v383_v26 }
  0x42   :  { %v387_v29 = vpop.eup %386 }
  0x43   :  { %v114_v30 = vcombine.low %v385_v27, %v387_v29  ;;  %v121_v31 = vrot.slane %v113_v28, %v120_v25 }
  0x45   :  { %v128_v32 = vrot.slane %v114_v30, %v120_v25 }
  0x47   :  { %v129_v33 = vcombine.low %v121_v31, %v128_v32 }
  0x49   :  { %v136_v36 = vrot.slane %v129_v33, %v120_v25 }
  0x4b   :  { %v138_v41 = vmul.f32 %v136_v36, %v100_v34 }
  0x4d   :  { %v147_v50 = vrot.slane %v138_v41, %v146_v35  ;;  %v143_v51 = vrot.slane %v138_v41, %v142_v38  ;;  %v155_v52 = vrot.slane %v138_v41, %v154_v39  ;;  %v151_v53 = vrot.slane %v138_v41, %v150_v40 }
  0x4f   :  { %v161_v54 = vmul.f32 %v147_v50, %v466_v45  ;;  %v160_v55 = vmul.f32 %v143_v51, %v464_v44  ;;  %v163_v56 = vmul.f32 %v155_v52, %v470_v47  ;;  %v162_v57 = vmul.f32 %v151_v53, %v468_v46  ;;  %v372_v44 = vld [vmem:[%s507_s3] ss:$0 sm:$0xff] }
  0x51   :  { %v187_v58 = vadd.f32 %v173_v42, %v161_v54  ;;  %v186_v59 = vadd.f32 %v169_v43, %v160_v55  ;;  %v189_v3 = vadd.f32 %v181_v48, %v163_v56  ;;  %v188_v60 = vadd.f32 %v177_v49, %v162_v57 }
  0x53   :  { %v191_v61 = vmax.f32 %v187_v58, 0.0  ;;  %v190_v62 = vmax.f32 %v186_v59, 0.0  ;;  %v193_v63 = vmax.f32 %v189_v3, 0.0  ;;  %v192_v0 = vmax.f32 %v188_v60, 0.0 }
  0x55   :  { %288 = vmatprep.mubr.f32.mxu1 %v191_v61  ;;  %358 = vmatprep.mubr.f32.mxu0 %v193_v63 }
  0x56   :  { %289 = vmatmul.mubr.f32.vlgmr.msra.gmra.mrb[0].mxu1 %v190_v62  ;;  %359 = vmatmul.mubr.f32.vlgmr.msra.gmra.mrb[0].mxu0 %v192_v0 }
 0x129   :  { %v290_v45 = vpop.f32.mrb[0].mxu1  ;;  %v360_v46 = vpop.f32.mrb[0].mxu0 }
 0x12a   :  { %v291_v47 = vadd.f32 %v372_v44, %v290_v45  ;;  %v292_v2 = vpop.f32.mrb[1].mxu1  ;;  %v362_v4 = vpop.f32.mrb[1].mxu0 }
 0x12c   :  { %v361_v5 = vadd.f32 %v360_v46, %v291_v47 }
 0x12e   :  { %366 = vst.msk [vmem:[%s509_s5] sm:$0xff] %vm365_vm0, %v361_v5 }
 0x12f   :  { %371 = vsyncpa [#allocation3], 1 }

</bundles_post_ra>
